<compile_context>
chip_gen: v5e
topology: v5e:2x2
jax: 0.10.0
libtpu: 0.0.40
codegen_flags: <defaults>
</compile_context>

<pallas_src>
import functools

import jax
import jax.numpy as jnp
from jax.experimental import pallas as pl
from jax.experimental.pallas import tpu as pltpu


def _patch_merging_kernel(x_ref, wg_ref, b_ref, o_ref, *, eps):
    # x_ref:  (4C, TN)  merged channels on sublanes, pixels on lanes
    # wg_ref: (2C, 4C)  reduction weight with LN gamma pre-folded
    # b_ref:  (2C, 1)   W @ beta (LN bias folded through the reduction)
    # o_ref:  (2C, TN)
    xf = x_ref[...].astype(jnp.float32)

    # Per-pixel (per-lane column) LayerNorm stats over the 4C channel sublanes.
    mu = jnp.mean(xf, axis=0, keepdims=True)             # (1, TN)
    xc = xf - mu
    var = jnp.mean(xc * xc, axis=0, keepdims=True)       # (1, TN), unbiased=False
    inv = jax.lax.rsqrt(var + eps)                       # (1, TN)

    # (W*gamma) @ (x - mu) on the MXU; per-pixel scalars commute with the
    # channel contraction, so inv and the folded bias are applied on the
    # small (2C, TN) result instead of the (4C, TN) input.
    t = jnp.dot(wg_ref[...].astype(jnp.float32), xc,
                preferred_element_type=jnp.float32)      # (2C, TN)
    y = t * inv + b_ref[...].astype(jnp.float32)
    o_ref[...] = y.astype(o_ref.dtype)


def _pick_tile(npix, c4, c2, itemsize, budget_bytes=16 * 1024 * 1024):
    """Pick a lane-dense pixel-tile size that fits a VMEM budget."""
    if npix <= 256:
        return npix                                  # full extent: always legal
    # double-buffered in/out blocks + f32 temporaries inside the kernel
    per_lane = (c4 + c2) * itemsize * 2 + 2 * c4 * 4
    t = min(npix, budget_bytes // per_lane)
    t = max((t // 128) * 128, 128)
    if npix % t:
        # Prefer a nearby multiple-of-128 divisor of npix (no masked tail),
        # but never shrink below half the target / 512 lanes.
        d = t
        floor = max(512, t // 2)
        while d >= floor:
            if npix % d == 0:
                return d
            d -= 128
    return t


@functools.partial(jax.jit, static_argnames=("eps",))
def patch_merging_forward(x, gamma, beta, w_red, *, eps=1e-5):
    """x: (B, C, H, W); gamma/beta: (4C,); w_red: (2C, 4C). Returns (B, 2C, H/2, W/2)."""
    B, C, H, W = x.shape
    assert H % 2 == 0 and W % 2 == 0, "PatchMerging requires even H and W"
    Ho, Wo = H // 2, W // 2
    C4, C2 = 4 * C, 2 * C
    assert gamma.shape == (C4,) and beta.shape == (C4,)
    assert w_red.shape == (C2, C4)

    # 2x2 spatial -> channel gather as one reshape+transpose pass.
    # Channel order matches torch.cat([x0, x1, x2, x3], 1):
    #   merged_channel = (dc*2 + dr)*C + c
    npix = Ho * Wo
    xm = (x.reshape(B, C, Ho, 2, Wo, 2)
           .transpose(0, 5, 3, 1, 2, 4)              # (B, dc, dr, C, Ho, Wo)
           .reshape(B, C4, npix))                    # free reshape, pixel-last

    # Fold LN affine params through the 1x1 conv (tiny wrapper-side ops).
    wg = w_red.astype(jnp.float32) * gamma.astype(jnp.float32)[None, :]   # (2C, 4C)
    bf = (w_red.astype(jnp.float32) @ beta.astype(jnp.float32)).reshape(C2, 1)

    tile_n = _pick_tile(npix, C4, C2, x.dtype.itemsize)
    grid = (B, pl.cdiv(npix, tile_n))

    kernel = functools.partial(_patch_merging_kernel, eps=float(eps))

    out = pl.pallas_call(
        kernel,
        out_shape=jax.ShapeDtypeStruct((B, C2, npix), x.dtype),
        grid_spec=pltpu.PrefetchScalarGridSpec(
            num_scalar_prefetch=0,
            grid=grid,
            in_specs=[
                # batch dim squeezed; (4C, TN) tile, lane-dense pixel axis
                pl.BlockSpec((None, C4, tile_n), lambda b, n: (b, 0, n)),
                pl.BlockSpec((C2, C4), lambda b, n: (0, 0)),   # fused weight (resident)
                pl.BlockSpec((C2, 1), lambda b, n: (0, 0)),    # fused bias   (resident)
            ],
            out_specs=pl.BlockSpec((None, C2, tile_n), lambda b, n: (b, 0, n)),
        ),
        compiler_params=pltpu.CompilerParams(
            dimension_semantics=("parallel", "parallel"),
            vmem_limit_bytes=48 * 1024 * 1024,
        ),
    )(xm, wg, bf)

    return out.reshape(B, C2, Ho, Wo)


def _reference(x, gamma, beta, w_red, eps=1e-5):
    # Pure-JAX reference mirroring the PyTorch module (independent code path).
    x0 = x[:, :, 0::2, 0::2]
    x1 = x[:, :, 1::2, 0::2]
    x2 = x[:, :, 0::2, 1::2]
    x3 = x[:, :, 1::2, 1::2]
    xm = jnp.concatenate([x0, x1, x2, x3], axis=1)            # (B, 4C, Ho, Wo)
    xt = jnp.transpose(xm, (0, 2, 3, 1)).astype(jnp.float32)  # NHWC
    mu = xt.mean(-1, keepdims=True)
    var = ((xt - mu) ** 2).mean(-1, keepdims=True)            # unbiased=False
    xn = (xt - mu) / jnp.sqrt(var + eps) * gamma + beta
    y = jnp.einsum("bhwc,oc->bohw", xn, w_red.astype(jnp.float32))
    return y.astype(x.dtype)


if __name__ == "__main__":
    # Module config: dim=4 -> norm over 4*dim=16 channels, reduction 16 -> 8.
    dim = 4
    B, C, H, W = 2, dim, 16, 16
    C4, C2 = 4 * dim, 2 * dim

    key = jax.random.PRNGKey(0)
    kx, kg, kb, kw = jax.random.split(key, 4)

    x = jax.random.normal(kx, (B, C, H, W), dtype=jnp.float32)
    gamma = 1.0 + 0.1 * jax.random.normal(kg, (C4,), dtype=jnp.float32)
    beta = 0.1 * jax.random.normal(kb, (C4,), dtype=jnp.float32)
    # Conv2d(4C, 2C, 1, bias=False) weight (2C, 4C, 1, 1) -> matrix (2C, 4C).
    w_red = 0.1 * jax.random.normal(kw, (C2, C4), dtype=jnp.float32)

    out = patch_merging_forward(x, gamma, beta, w_red)
    out = jax.block_until_ready(out)

    ref = _reference(x, gamma, beta, w_red)
    assert out.shape == (B, C2, H // 2, W // 2), out.shape
    assert jnp.allclose(out, ref, atol=1e-4, rtol=1e-4), "mismatch vs reference"

    print("KERNEL_OK")
</pallas_src>

<mosaic_0001>
module attributes {stable_mosaic.version = 11 : i64} {
  func.func @_patch_merging_kernel(%arg0: i32, %arg1: i32, %arg2: memref<1x16x64xf32, #tpu.memory_space<vmem>>, %arg3: memref<8x16xf32, #tpu.memory_space<vmem>>, %arg4: memref<8x1xf32, #tpu.memory_space<vmem>>, %arg5: memref<1x8x64xf32, #tpu.memory_space<vmem>>) attributes {dimension_semantics = [#tpu.dimension_semantics<parallel>, #tpu.dimension_semantics<parallel>], iteration_bounds = array<i64: 2, 1>, scalar_prefetch = 0 : i64, scratch_operands = 0 : i64, tpu.core_type = #tpu.core_type<tc>, window_params = [{transform_indices = @transform_0, window_bounds = array<i64: 1, 16, 64>}, {pipeline_mode = #tpu.pipeline_mode<synchronous>, transform_indices = @transform_1, window_bounds = array<i64: 8, 16>}, {pipeline_mode = #tpu.pipeline_mode<synchronous>, transform_indices = @transform_2, window_bounds = array<i64: 8, 1>}, {transform_indices = @transform_3, window_bounds = array<i64: 1, 8, 64>}]} {
    %c0 = arith.constant 0 : index
    %c0_0 = arith.constant 0 : index
    %c0_1 = arith.constant 0 : index
    %0 = vector.load %arg2[%c0, %c0_0, %c0_1] : memref<1x16x64xf32, #tpu.memory_space<vmem>>, vector<1x16x64xf32>
    %1 = vector.shape_cast %0 : vector<1x16x64xf32> to vector<16x64xf32>
    %cst = arith.constant dense<0.000000e+00> : vector<64xf32>
    %2 = vector.multi_reduction <add>, %1, %cst [0] : vector<16x64xf32> to vector<64xf32>
    %3 = vector.shape_cast %2 : vector<64xf32> to vector<1x64xf32>
    %cst_2 = arith.constant 1.600000e+01 : f32
    %4 = vector.broadcast %cst_2 : f32 to vector<1x64xf32>
    %5 = arith.divf %3, %4 : vector<1x64xf32>
    %6 = vector.broadcast %5 : vector<1x64xf32> to vector<16x64xf32>
    %7 = arith.subf %1, %6 : vector<16x64xf32>
    %8 = arith.mulf %7, %7 : vector<16x64xf32>
    %cst_3 = arith.constant dense<0.000000e+00> : vector<64xf32>
    %9 = vector.multi_reduction <add>, %8, %cst_3 [0] : vector<16x64xf32> to vector<64xf32>
    %10 = vector.shape_cast %9 : vector<64xf32> to vector<1x64xf32>
    %cst_4 = arith.constant 1.600000e+01 : f32
    %11 = vector.broadcast %cst_4 : f32 to vector<1x64xf32>
    %12 = arith.divf %10, %11 : vector<1x64xf32>
    %cst_5 = arith.constant 9.99999974E-6 : f32
    %13 = vector.broadcast %cst_5 : f32 to vector<1x64xf32>
    %14 = arith.addf %12, %13 : vector<1x64xf32>
    %15 = math.rsqrt %14 : vector<1x64xf32>
    %c0_6 = arith.constant 0 : index
    %c0_7 = arith.constant 0 : index
    %16 = vector.load %arg3[%c0_6, %c0_7] : memref<8x16xf32, #tpu.memory_space<vmem>>, vector<8x16xf32>
    %cst_8 = arith.constant dense<0.000000e+00> : vector<8x64xf32>
    %17 = tpu.matmul %16, %7, %cst_8 {dimension_numbers = #tpu.dot_dimension_numbers<[1], [0], [0], [1], [0, 0, 1, 1], [], []>} : vector<8x16xf32>, vector<16x64xf32>, vector<8x64xf32> -> vector<8x64xf32>
    %18 = vector.broadcast %15 : vector<1x64xf32> to vector<8x64xf32>
    %19 = arith.mulf %17, %18 : vector<8x64xf32>
    %c0_9 = arith.constant 0 : index
    %c0_10 = arith.constant 0 : index
    %20 = vector.load %arg4[%c0_9, %c0_10] : memref<8x1xf32, #tpu.memory_space<vmem>>, vector<8x1xf32>
    %21 = vector.broadcast %20 : vector<8x1xf32> to vector<8x64xf32>
    %22 = arith.addf %19, %21 : vector<8x64xf32>
    %c0_11 = arith.constant 0 : index
    %c0_12 = arith.constant 0 : index
    %c0_13 = arith.constant 0 : index
    %23 = vector.load %arg5[%c0_11, %c0_12, %c0_13] : memref<1x8x64xf32, #tpu.memory_space<vmem>>, vector<1x8x64xf32>
    %24 = vector.shape_cast %23 : vector<1x8x64xf32> to vector<8x64xf32>
    %25 = vector.shape_cast %22 : vector<8x64xf32> to vector<1x8x64xf32>
    tpu.vector_store %arg5[%c0_11, %c0_12, %c0_13], %25 {strides = array<i32>} : memref<1x8x64xf32, #tpu.memory_space<vmem>>, vector<1x8x64xf32>,
    return
  }
  func.func @transform_0(%arg0: i32, %arg1: i32) -> (i32, i32, i32) {
    %c0_i32 = arith.constant 0 : i32
    %c0_i32_0 = arith.constant 0 : i32
    return %arg0, %c0_i32, %arg1 : i32, i32, i32
  }
  func.func @transform_1(%arg0: i32, %arg1: i32) -> (i32, i32) {
    %c0_i32 = arith.constant 0 : i32
    %c0_i32_0 = arith.constant 0 : i32
    %c0_i32_1 = arith.constant 0 : i32
    return %c0_i32, %c0_i32_0 : i32, i32
  }
  func.func @transform_2(%arg0: i32, %arg1: i32) -> (i32, i32) {
    %c0_i32 = arith.constant 0 : i32
    %c0_i32_0 = arith.constant 0 : i32
    %c0_i32_1 = arith.constant 0 : i32
    return %c0_i32, %c0_i32_0 : i32, i32
  }
  func.func @transform_3(%arg0: i32, %arg1: i32) -> (i32, i32, i32) {
    %c0_i32 = arith.constant 0 : i32
    %c0_i32_0 = arith.constant 0 : i32
    return %arg0, %c0_i32, %arg1 : i32, i32, i32
  }
}

</mosaic_0001>

<bundles_post_ra>
// kernel: patch_merging_forward.1
= control target key start
LH: loop header
LB: loop body
LE: loop exit
PB: predicated region body
PF: predicated region fallthrough
CT: control target
= control target key end

     0   :  { %s445_s12 = smov 0   ;;  %s447_s13 = smov 0   ;;  %s493_s0 = inlined_call_operand.vmem [shape: f32[2,16,64], index: 0, kind: input, shape index: {}]   ;;  %s494_s1 = inlined_call_operand.vmem [shape: f32[8,16], index: 1, kind: input, shape index: {}]   ;;  %s495_s2 = inlined_call_operand.vmem [shape: f32[8,1], index: 2, kind: input, shape index: {}]   ;;  %s496_s3 = inlined_call_operand.vmem [shape: f32[2,8,64], index: 3, kind: output, shape index: {}]  }
   0x1   :  { %s449_s14 = smov 0  }
   0x2 LB: > { %s25_s15 = sadd.s32 1, %s417_s13  ;;  %p360_p0 = scmp.ge.s32.totalorder %s421_s14, 1  ;;  %s421_s14 = sphi %s449_s14, %s13_s14   ;;  %s417_s13 = sphi %s447_s13, %s498_s13   ;;  %s413_s12 = sphi %s445_s12, %s497_s12  }
   0x3   : > { %p27_p1 = scmp.ge.s32.totalorder %s25_s15, 2  ;;  %p156_p2 = scmp.lt.s32.totalorder %s421_s14, 3 }
   0x5   : > { %s500_s15 = smov (%p27_p1, %s25_s15), 0  ;;  %p157_p3 = pnand %p360_p0, %p156_p2 }
   0x6   : > { %p185_p4 = scmp.lt.s32.totalorder (!%p157_p3), %s413_s12, 1 }
   0x7   : > { %160 = sbr.rel (%p157_p3) target bundleno = 169 (0xa9), region = 32 }
   0xc   : > { %v423_v0 = vmov 16.0   ;;  %s502_s12 = smov (!%p185_p4, %s413_s12), 1  ;;  %vm202_vm0 = vcmask 523264   ;;  %v271_v6 = vld [vmem:[%s495_s2] sm:$0xff]  ;;  %v424_v9 = vmov 0   ;;  %vm246_vm2 = vcmask 130048  }
   0xd   : > { %395 = vrcp.f32 %v423_v0  ;;  %s367_s16 = sshll.u32 %s502_s12, 4  ;;  %394 = vset.pattern.permute.xlu0 %v424_v9  ;;  %v245_v25 = vld [vmem:[%s494_s1] sm:$0xff]  ;;  %s363_s24 = sshll.u32 %s502_s12, 3 }
   0xe   : > { %s192_s19 = scalar_lea.vmem %s493_s0, %s367_s16  ;;  %274 = vperm.xlu0 %394, %v271_v6   ;;  %s199_s27 = scalar_lea.vmem %s496_s3, %s363_s24 }
   0xf   : > { %v200_v1 = vld [vmem:[%s192_s19] sm:$0xff]  ;;  %v201_v2 = vld [vmem:[%s192_s19 + $0x8] sm:$0xff] }
  0x10   : > { %v203_v4 = vsel %vm202_vm0, %v200_v1, 0.0  ;;  %v204_v5 = vsel %vm202_vm0, %v201_v2, 0.0 }
  0x11   : > { %v205_v7 = vadd.f32 %v204_v5, %v203_v4 }
  0x13   : > { %v396_v3 = vpop.eup %395  ;;  %v206_v10 = vrot.slane %v205_v7, 4 }
  0x14   : > { %v213_v8 = vmul.f32 16.0, %v396_v3  ;;  %vm217_vm1 = vweird.f32 %v396_v3 }
  0x15   : > { %v207_v12 = vadd.f32 %v206_v10, %v205_v7 }
  0x16   : > { %v214_v11 = vsub.f32 1.0, %v213_v8 }
  0x17   : > { %v208_v14 = vrot.slane %v207_v12, 2 }
  0x18   : > { %v215_v13 = vmul.f32 %v396_v3, %v214_v11 }
  0x19   : > { %v209_v16 = vadd.f32 %v208_v14, %v207_v12 }
  0x1a   : > { %v216_v15 = vadd.f32 %v396_v3, %v215_v13 }
  0x1b   : > { %v210_v17 = vrot.slane %v209_v16, 1 }
  0x1c   : > { %v218_v18 = vsel %vm217_vm1, %v396_v3, %v216_v15 }
  0x1d   : > { %v211_v19 = vadd.f32 %v210_v17, %v209_v16 }
  0x1f   : > { %v219_v20 = vmul.f32 %v218_v18, %v211_v19 }
  0x21   : > { %v221_v21 = vsub.f32 %v201_v2, %v219_v20  ;;  %v220_v22 = vsub.f32 %v200_v1, %v219_v20 }
  0x23   : > { %v223_v23 = vmul.f32 %v221_v21, %v221_v21  ;;  %264 = vmatpush.msra.mxu0 %v221_v21  ;;  %v222_v24 = vmul.f32 %v220_v22, %v220_v22 }
  0x25   : > { %v225_v26 = vsel %vm202_vm0, %v223_v23, 0.0  ;;  %v224_v27 = vsel %vm202_vm0, %v222_v24, 0.0  ;;  %265 = vmatpush.msra.mxu0 %v220_v22 }
  0x26   : > { %v226_v28 = vadd.f32 %v225_v26, %v224_v27  ;;  %364 = vmatmul.msk.f32.vlgmr.msra.gmra.mxu0 %vm246_vm2, %v245_v25 }
  0x28   : > { %v227_v29 = vrot.slane %v226_v28, 4 }
  0x2a   : > { %v228_v30 = vadd.f32 %v227_v29, %v226_v28 }
  0x2c   : > { %v229_v31 = vrot.slane %v228_v30, 2 }
  0x2e   : > { %v230_v32 = vadd.f32 %v229_v31, %v228_v30 }
  0x30   : > { %v231_v33 = vrot.slane %v230_v32, 1 }
  0x32   : > { %v232_v34 = vadd.f32 %v231_v33, %v230_v32 }
  0x34   : > { %v233_v35 = vmul.f32 %v232_v34, %v218_v18 }
  0x36   : > { %v234_v36 = vadd.f32 1e-05, %v233_v35 }
  0x38   : > { %397 = vrsqrt.f32 %v234_v36  ;;  %vm241_vm3 = vweird.f32 %v234_v36 }
  0x3e   : > { %v398_v37 = vpop.eup %397 }
  0x3f   : > { %v236_v38 = vmul.f32 %v398_v37, %v234_v36  ;;  %vm242_vm4 = vweird.f32 %v398_v37 }
  0x40   : > { %vm243_vm5 = vmor %vm241_vm3, %vm242_vm4 }
  0x41   : > { %v237_v39 = vmul.f32 %v398_v37, %v236_v38 }
  0x43   : > { %v238_v40 = vmul.f32 0.5, %v237_v39 }
  0x45   : > { %v239_v41 = vsub.f32 1.5, %v238_v40 }
  0x47   : > { %v240_v42 = vmul.f32 %v398_v37, %v239_v41 }
  0x49   : > { %v244_v43 = vsel %vm243_vm5, %v398_v37, %v240_v42 }
  0x80   : > { %v275_v45 = vpop.permute.xlu0 %274 }
  0xa3   : > { %v267_v44 = vpop.f32.mrf.mxu0 }
  0xa4   : > { %v270_v46 = vmul.f32 %v267_v44, %v244_v43 }
  0xa6   : > { %v277_v47 = vadd.f32 %v275_v45, %v270_v46 }
  0xa8   : > { %278 = vst.msk [vmem:[%s199_s27] sm:$0xff] %vm202_vm0, %v277_v47 }
  0xa9 PF: > { %s13_s14 = sadd.s32 1, %s421_s14   ;;  %s497_s12 = smov %s417_s13 }
  0xaa   : > { %p10_p5 = scmp.ge.s32.totalorder %s13_s14, 4   ;;  %s498_s13 = smov %s500_s15 }
  0xac   :  { %12 = sbr.rel (!%p10_p5) target bundleno = 2 (0x2), region = 62 }

</bundles_post_ra>
